<compile_context>
chip_gen: v5e
topology: v5e:2x2
jax: 0.10.0
libtpu: 0.0.40
codegen_flags: <defaults>
</compile_context>

<pallas_src>
import numpy as np
import jax
import jax.numpy as jnp
from jax.experimental import pallas as pl
from jax.experimental.pallas import tpu as pltpu

HIDDEN_DIM = 32
ORDER = 3
NUM_CONVS = 2
NUM_NOISE_LEVEL = 10
SIGMA_BEGIN, SIGMA_END = 10.0, 0.01
ANNEAL_POWER = 2.0          # kernel hard-codes sigma**anneal_power == sigma*sigma
NUM_BOND_TYPES = 22         # len(utils.BOND_TYPES) in the reference repo


# ----------------------------------------------------------------------
# Pallas kernel: the full edge/node hot path of ContinuousScoreMatch.forward
# ----------------------------------------------------------------------
def score_match_kernel(
    d_ref, noise_ref, sigma_ref,                  # (E,1) f32 each (E = padded edges)
    src_ref, dst_ref, e2g_ref,                    # (E,1) int32, pad rows == -1
    node_attr_ref, edge_emb_ref,                  # (N,H) f32, (E,H) f32
    in_w1_ref, in_b1_ref, in_w2_ref, in_b2_ref,   # input_mlp: Linear(1,H), Linear(H,H)
    conv_w1_ref, conv_b1_ref, conv_w2_ref, conv_b2_ref,  # (C,H,H) bf16 / (C,1,H) f32
    out_w1a_ref, out_w1b_ref, out_b1_ref,         # output_mlp layer 1, (H,H)+(H,H) split
    out_w2_ref, out_b2_ref, out_w3_ref, out_b3_ref,
    loss_ref,                                     # out: (1, Gp) lane-dense
):
    f32, bf16 = jnp.float32, jnp.bfloat16
    E = d_ref.shape[0]
    N = node_attr_ref.shape[0]
    G_pad = loss_ref.shape[1]

    d = d_ref[...]            # (E,1) edge lengths (0 for padded edges)
    noise = noise_ref[...]    # (E,1) d_noise   (noise_type == 'rand')
    sigma = sigma_ref[...]    # (E,1) used_sigmas (1.0 for padded edges)
    inv_sigma = 1.0 / sigma   # exact: this feeds the training target (sigma can be 0.01)

    # perturbed_d = d + noise*sigma ;  target = -1/sigma^2*(perturbed_d-d) == -noise/sigma
    perturbed_d = d + noise * sigma
    target = -noise * inv_sigma

    # input_mlp: Linear(1,H) -> relu -> Linear(H,H)   (bias/relu in f32, dot in bf16)
    h = jnp.maximum(perturbed_d * in_w1_ref[...] + in_b1_ref[...], 0.0)   # == (E,1)@(1,H)+b
    d_emb = jnp.dot(h.astype(bf16), in_w2_ref[...],
                    preferred_element_type=f32) + in_b2_ref[...]

    # edge_attr = d_emb * edge_emb(edge_type)   (zero rows for padded edges)
    edge_attr = d_emb * edge_emb_ref[...]                                  # (E,H) f32

    # Build bf16 one-hot gather/scatter operands IN-KERNEL from int32 indices
    # (pad rows have index -1 -> all-false -> zero rows).  No HBM one-hots.
    node_iota = jax.lax.broadcasted_iota(jnp.int32, (E, N), 1)
    s_src = (src_ref[...] == node_iota).astype(bf16)                       # (E,N)
    s_dst = (dst_ref[...] == node_iota).astype(bf16)                       # (E,N)

    # GraphIsomorphismNetwork (GINEConv x NUM_CONVS, readout not needed)
    x = node_attr_ref[...]                                                 # (N,H) f32
    for c in range(NUM_CONVS):
        # gather x[edge_index[0]]: bf16 one-hot @ bf16 features, f32 accumulate
        x_j = jnp.dot(s_src, x.astype(bf16), preferred_element_type=f32)   # (E,H)
        msg = jnp.maximum(x_j + edge_attr, 0.0)                            # message act
        # scatter_add over edge_index[1]: contract E axis of s_dst on the MXU
        agg = jax.lax.dot_general(s_dst, msg.astype(bf16),
                                  dimension_numbers=(((0,), (0,)), ((), ())),
                                  preferred_element_type=f32)              # (N,H)
        out = agg + x                                                      # (1+eps)*x, eps=0
        h1 = jnp.maximum(
            jnp.dot(out.astype(bf16), conv_w1_ref[c],
                    preferred_element_type=f32) + conv_b1_ref[c], 0.0)
        hidden = jnp.dot(h1.astype(bf16), conv_w2_ref[c],
                         preferred_element_type=f32) + conv_b2_ref[c]
        if c < NUM_CONVS - 1:
            hidden = jnp.maximum(hidden, 0.0)                              # inter-conv act
        x = hidden                                                         # short_cut=False

    # h_row / h_col gathers of the final node features
    xb = x.astype(bf16)
    h_row = jnp.dot(s_src, xb, preferred_element_type=f32)                 # (E,H)
    h_col = jnp.dot(s_dst, xb, preferred_element_type=f32)                 # (E,H)

    # output_mlp on cat([h_row*h_col, edge_attr], -1): split-weight form (no concat);
    # two K=H bf16 dots accumulate into one f32 result.
    hrhc = h_row * h_col
    z = (jnp.dot(hrhc.astype(bf16), out_w1a_ref[...], preferred_element_type=f32)
         + jnp.dot(edge_attr.astype(bf16), out_w1b_ref[...], preferred_element_type=f32)
         + out_b1_ref[...])
    z = jnp.maximum(z, 0.0)
    z = jnp.maximum(
        jnp.dot(z.astype(bf16), out_w2_ref[...],
                preferred_element_type=f32) + out_b2_ref[...], 0.0)
    # last layer Linear(H//2, 1) as a lane reduction (f32)
    scores = jnp.sum(z * out_w3_ref[...], axis=-1, keepdims=True) + out_b3_ref[...]  # (E,1)
    scores = scores * inv_sigma

    # loss = 0.5*(scores-target)^2 * sigma**2
    loss_e = 0.5 * (scores - target) ** 2 * (sigma * sigma)                # (E,1) f32

    # scatter_add over graphs: exact-f32 masked reduction into the lane-dense slab
    # (G << 128, so no (E,G_pad) matmul operand; pad edges have e2g == -1 -> no column).
    g_iota = jax.lax.broadcasted_iota(jnp.int32, (E, G_pad), 1)
    g_mask = (e2g_ref[...] == g_iota).astype(f32)                          # (E,Gp)
    loss_ref[...] = jnp.sum(loss_e * g_mask, axis=0, keepdims=True)        # (1,Gp)


# ----------------------------------------------------------------------
# Wrapper: pads edge arrays, casts MXU weights to bf16, calls the kernel.
# ----------------------------------------------------------------------
def continuous_score_match_pallas(params, d, d_noise, used_sigmas, node_attr,
                                  edge_emb, edge_index, edge2graph,
                                  num_nodes, num_graphs):
    assert ANNEAL_POWER == 2.0, "kernel hard-codes sigma**anneal_power as sigma*sigma"
    f32, bf16, i32 = jnp.float32, jnp.bfloat16, jnp.int32
    N, G, H = num_nodes, num_graphs, HIDDEN_DIM
    E = d.shape[0]
    E_pad = ((E + 15) // 16) * 16                 # sublane + bf16-packing aligned
    G_pad = max(128, ((G + 127) // 128) * 128)    # lane-dense loss output

    def pad_rows(x, rows, fill=0):
        return jnp.pad(x, ((0, rows - x.shape[0]), (0, 0)), constant_values=fill)

    d_p = pad_rows(d.astype(f32), E_pad)
    noise_p = pad_rows(d_noise.astype(f32), E_pad)
    sigma_p = pad_rows(used_sigmas.astype(f32), E_pad, fill=1.0)   # avoid 1/0 on pad rows
    edge_emb_p = pad_rows(edge_emb.astype(f32), E_pad)             # pad rows -> edge_attr = 0
    # Only int32 index vectors cross HBM; pad index -1 never matches the in-kernel iota,
    # so pad edges gather zeros, scatter nothing and hit no loss column.
    src_p = pad_rows(edge_index[0][:, None].astype(i32), E_pad, fill=-1)
    dst_p = pad_rows(edge_index[1][:, None].astype(i32), E_pad, fill=-1)
    e2g_p = pad_rows(edge2graph[:, None].astype(i32), E_pad, fill=-1)

    out_w1 = params['out_w1']                     # (2H, H): split into two (H,H) halves
    args = (d_p, noise_p, sigma_p, src_p, dst_p, e2g_p,
            node_attr.astype(f32), edge_emb_p,
            params['in_w1'], params['in_b1'],
            params['in_w2'].astype(bf16), params['in_b2'],
            params['conv_w1'].astype(bf16), params['conv_b1'],
            params['conv_w2'].astype(bf16), params['conv_b2'],
            out_w1[:H].astype(bf16), out_w1[H:].astype(bf16), params['out_b1'],
            params['out_w2'].astype(bf16), params['out_b2'],
            params['out_w3'].T, params['out_b3'])

    operand_bytes = sum(int(np.prod(a.shape)) * jnp.dtype(a.dtype).itemsize for a in args)
    out_bytes = G_pad * 4
    # In-kernel intermediates: bf16 one-hots, the (E,Gp) loss mask, f32 activations.
    scratch_bytes = 2 * E_pad * N * 2 + E_pad * G_pad * 4 + 10 * E_pad * H * 4

    # Generation-aware VMEM budget: physical capacity minus 8 MiB compiler headroom
    # (~56 MiB on v7x, ~120 MiB on v5e/v6e) instead of a blanket 64 MiB clamp.
    try:
        vmem_cap = int(pltpu.get_tpu_info().vmem_capacity_bytes)
    except Exception:
        vmem_cap = 64 << 20
    need = 4 * (operand_bytes + out_bytes) + 2 * scratch_bytes + (4 << 20)
    vmem_limit = int(min(max(need, 32 << 20), vmem_cap - (8 << 20)))

    flops = (
        2 * E_pad * H * (1 + H)                                    # input_mlp
        + NUM_CONVS * (2 * 2 * E_pad * N * H + 2 * 2 * N * H * H)  # gathers/scatters + conv MLPs
        + 2 * 2 * E_pad * N * H                                    # h_row / h_col gathers
        + 2 * E_pad * (2 * H * H + H * (H // 2) + (H // 2))        # output_mlp
        + 2 * E_pad * G_pad)                                       # per-graph loss reduce
    cost = pl.CostEstimate(flops=int(flops), transcendentals=0,
                           bytes_accessed=int(operand_bytes + out_bytes))

    out = pl.pallas_call(
        score_match_kernel,
        out_shape=jax.ShapeDtypeStruct((1, G_pad), jnp.float32),
        in_specs=[pl.BlockSpec(memory_space=pltpu.MemorySpace.VMEM)] * len(args),
        out_specs=pl.BlockSpec(memory_space=pltpu.MemorySpace.VMEM),
        compiler_params=pltpu.CompilerParams(vmem_limit_bytes=vmem_limit),
        cost_estimate=cost,
    )(*args)
    return out[0, :G]   # (G,) per-graph loss == scatter_add(loss, edge2graph)


# ----------------------------------------------------------------------
# Graph preprocessing (extend_graph, @torch.no_grad glue) — numpy.
# ----------------------------------------------------------------------
def extend_graph_np(edge_index, edge_type, num_nodes, order):
    N = num_nodes
    adj = np.zeros((N, N), dtype=np.int64)
    adj[edge_index[0], edge_index[1]] = 1
    type_mat = np.zeros((N, N), dtype=np.int64)
    type_mat[edge_index[0], edge_index[1]] = edge_type

    def binarize(x):
        return (x > 0).astype(np.int64)

    adj_mats = [np.eye(N, dtype=np.int64),
                binarize(adj + np.eye(N, dtype=np.int64))]
    for i in range(2, order + 1):
        adj_mats.append(binarize(adj_mats[i - 1] @ adj_mats[1]))
    order_mat = np.zeros_like(adj)
    for i in range(1, order + 1):
        order_mat += (adj_mats[i] - adj_mats[i - 1]) * i

    type_highorder = np.where(order_mat > 1, NUM_BOND_TYPES + order_mat - 1,
                              np.zeros_like(order_mat))
    assert (type_mat * type_highorder == 0).all()
    type_new = type_mat + type_highorder

    rows, cols = np.nonzero(type_new)        # row-major nonzero == coalesce order
    new_edge_index = np.stack([rows, cols], axis=0)
    new_edge_type = type_new[rows, cols]
    return new_edge_index, new_edge_type


def _linear(key, fan_in, fan_out):
    kw, kb = jax.random.split(key)
    bound = 1.0 / np.sqrt(fan_in)
    w = jax.random.uniform(kw, (fan_in, fan_out), jnp.float32, -bound, bound)
    b = jax.random.uniform(kb, (1, fan_out), jnp.float32, -bound, bound)
    return w, b


# Pure-JAX f32 reference (independent gather/scatter path) for a sanity check.
def reference_forward(params, d, noise, sigma, node_attr, edge_emb,
                      edge_index, edge2graph, num_graphs, num_nodes):
    perturbed_d = d + noise * sigma
    target = -1.0 / sigma ** 2 * (perturbed_d - d)
    h = jnp.maximum(perturbed_d @ params['in_w1'] + params['in_b1'], 0.0)
    d_emb = h @ params['in_w2'] + params['in_b2']
    edge_attr = d_emb * edge_emb
    x = node_attr
    src, dst = edge_index[0], edge_index[1]
    for c in range(NUM_CONVS):
        msg = jnp.maximum(x[src] + edge_attr, 0.0)
        agg = jax.ops.segment_sum(msg, dst, num_segments=num_nodes)
        out = agg + x
        h1 = jnp.maximum(out @ params['conv_w1'][c] + params['conv_b1'][c], 0.0)
        hidden = h1 @ params['conv_w2'][c] + params['conv_b2'][c]
        if c < NUM_CONVS - 1:
            hidden = jnp.maximum(hidden, 0.0)
        x = hidden
    h_row, h_col = x[src], x[dst]
    feat = jnp.concatenate([h_row * h_col, edge_attr], axis=-1)
    z = jnp.maximum(feat @ params['out_w1'] + params['out_b1'], 0.0)
    z = jnp.maximum(z @ params['out_w2'] + params['out_b2'], 0.0)
    scores = z @ params['out_w3'] + params['out_b3']
    scores = scores * (1.0 / sigma)
    loss_e = (0.5 * (scores.reshape(-1) - target.reshape(-1)) ** 2
              * sigma.reshape(-1) ** ANNEAL_POWER)
    return jax.ops.segment_sum(loss_e, edge2graph, num_segments=num_graphs)


if __name__ == "__main__":
    # --- small batched graph: graph 0 = 5-node chain, graph 1 = 4-node chain ---
    bond_src = np.array([0, 1, 1, 2, 2, 3, 3, 4, 5, 6, 6, 7, 7, 8])
    bond_dst = np.array([1, 0, 2, 1, 3, 2, 4, 3, 6, 5, 7, 6, 8, 7])
    bond_edge_index = np.stack([bond_src, bond_dst])
    bond_edge_type = np.ones(bond_edge_index.shape[1], dtype=np.int64)  # single bonds
    node2graph_np = np.array([0] * 5 + [1] * 4)
    num_nodes, num_graphs = 9, 2

    edge_index_np, edge_type_np = extend_graph_np(
        bond_edge_index, bond_edge_type, num_nodes, ORDER)
    edge2graph_np = node2graph_np[edge_index_np[0]]

    key = jax.random.PRNGKey(0)
    key, k_pos, k_atom, k_lvl, k_noise = jax.random.split(key, 5)
    pos = jax.random.normal(k_pos, (num_nodes, 3), jnp.float32)
    atom_type = jax.random.randint(k_atom, (num_nodes,), 0, 100)

    edge_index = jnp.asarray(edge_index_np)
    edge_type = jnp.asarray(edge_type_np)
    edge2graph = jnp.asarray(edge2graph_np)

    # get_distance
    d = jnp.linalg.norm(pos[edge_index[0]] - pos[edge_index[1]], axis=-1)[:, None]

    # sigmas / noise (noise_type == 'rand')
    sigmas = jnp.asarray(
        np.exp(np.linspace(np.log(SIGMA_BEGIN), np.log(SIGMA_END), NUM_NOISE_LEVEL)),
        dtype=jnp.float32)
    noise_level = jax.random.randint(k_lvl, (num_graphs,), 0, NUM_NOISE_LEVEL)
    used_sigmas = sigmas[noise_level][edge2graph][:, None]
    d_noise = jax.random.normal(k_noise, d.shape, jnp.float32)
    # TODO(synk): noise_type='symmetry' and the time_continuous t_embed branch
    # are not exercised by this config and are not implemented.

    # --- deterministic parameters ---
    H, H2 = HIDDEN_DIM, HIDDEN_DIM // 2
    keys = jax.random.split(jax.random.PRNGKey(42), 16)
    node_emb_table = 0.1 * jax.random.normal(keys[0], (100, H), jnp.float32)
    edge_emb_table = 0.1 * jax.random.normal(keys[1], (100, H), jnp.float32)
    in_w1, in_b1 = _linear(keys[2], 1, H)
    in_w2, in_b2 = _linear(keys[3], H, H)
    cw1, cb1, cw2, cb2 = [], [], [], []
    for c in range(NUM_CONVS):
        w1, b1 = _linear(keys[4 + 2 * c], H, H)
        w2, b2 = _linear(keys[5 + 2 * c], H, H)
        cw1.append(w1); cb1.append(b1); cw2.append(w2); cb2.append(b2)
    out_w1, out_b1 = _linear(keys[10], 2 * H, H)
    out_w2, out_b2 = _linear(keys[11], H, H2)
    out_w3, out_b3 = _linear(keys[12], H2, 1)
    params = dict(in_w1=in_w1, in_b1=in_b1, in_w2=in_w2, in_b2=in_b2,
                  conv_w1=jnp.stack(cw1), conv_b1=jnp.stack(cb1),
                  conv_w2=jnp.stack(cw2), conv_b2=jnp.stack(cb2),
                  out_w1=out_w1, out_b1=out_b1, out_w2=out_w2, out_b2=out_b2,
                  out_w3=out_w3, out_b3=out_b3)

    # embedding lookups (glue)
    node_attr = node_emb_table[atom_type]   # (N, H)
    edge_emb = edge_emb_table[edge_type]    # (E, H)

    loss = continuous_score_match_pallas(
        params, d, d_noise, used_sigmas, node_attr, edge_emb,
        edge_index, edge2graph, num_nodes, num_graphs)
    loss = jax.block_until_ready(loss)

    ref = reference_forward(params, d, d_noise, used_sigmas, node_attr, edge_emb,
                            edge_index, edge2graph, num_graphs, num_nodes)
    # Tolerance accounts for bf16 gather/scatter and MLP-weight operands compared
    # against the all-f32 reference (targets and the loss reduction are exact f32).
    np.testing.assert_allclose(np.asarray(loss), np.asarray(ref),
                               rtol=5e-2, atol=1e-2)
    print("KERNEL_OK")
</pallas_src>

<mosaic_0001>
module attributes {stable_mosaic.version = 11 : i64} {
  func.func @score_match_kernel(%arg0: memref<32x1xf32, #tpu.memory_space<vmem>>, %arg1: memref<32x1xf32, #tpu.memory_space<vmem>>, %arg2: memref<32x1xf32, #tpu.memory_space<vmem>>, %arg3: memref<32x1xi32, #tpu.memory_space<vmem>>, %arg4: memref<32x1xi32, #tpu.memory_space<vmem>>, %arg5: memref<32x1xi32, #tpu.memory_space<vmem>>, %arg6: memref<9x32xf32, #tpu.memory_space<vmem>>, %arg7: memref<32x32xf32, #tpu.memory_space<vmem>>, %arg8: memref<1x32xf32, #tpu.memory_space<vmem>>, %arg9: memref<1x32xf32, #tpu.memory_space<vmem>>, %arg10: memref<32x32xbf16, #tpu.memory_space<vmem>>, %arg11: memref<1x32xf32, #tpu.memory_space<vmem>>, %arg12: memref<2x32x32xbf16, #tpu.memory_space<vmem>>, %arg13: memref<2x1x32xf32, #tpu.memory_space<vmem>>, %arg14: memref<2x32x32xbf16, #tpu.memory_space<vmem>>, %arg15: memref<2x1x32xf32, #tpu.memory_space<vmem>>, %arg16: memref<32x32xbf16, #tpu.memory_space<vmem>>, %arg17: memref<32x32xbf16, #tpu.memory_space<vmem>>, %arg18: memref<1x32xf32, #tpu.memory_space<vmem>>, %arg19: memref<32x16xbf16, #tpu.memory_space<vmem>>, %arg20: memref<1x16xf32, #tpu.memory_space<vmem>>, %arg21: memref<1x16xf32, #tpu.memory_space<vmem>>, %arg22: memref<1x1xf32, #tpu.memory_space<vmem>>, %arg23: memref<1x128xf32, #tpu.memory_space<vmem>>) attributes {dimension_semantics = [], scalar_prefetch = 0 : i64, scratch_operands = 0 : i64, tpu.core_type = #tpu.core_type<tc>} {
    %c0 = arith.constant 0 : index
    %c0_0 = arith.constant 0 : index
    %0 = vector.load %arg0[%c0, %c0_0] : memref<32x1xf32, #tpu.memory_space<vmem>>, vector<32x1xf32>
    %c0_1 = arith.constant 0 : index
    %c0_2 = arith.constant 0 : index
    %1 = vector.load %arg1[%c0_1, %c0_2] : memref<32x1xf32, #tpu.memory_space<vmem>>, vector<32x1xf32>
    %c0_3 = arith.constant 0 : index
    %c0_4 = arith.constant 0 : index
    %2 = vector.load %arg2[%c0_3, %c0_4] : memref<32x1xf32, #tpu.memory_space<vmem>>, vector<32x1xf32>
    %cst = arith.constant 1.000000e+00 : f32
    %3 = vector.broadcast %cst : f32 to vector<32x1xf32>
    %4 = arith.divf %3, %2 : vector<32x1xf32>
    %5 = arith.mulf %1, %2 : vector<32x1xf32>
    %6 = arith.addf %0, %5 : vector<32x1xf32>
    %cst_5 = arith.constant 0.000000e+00 : f32
    %7 = vector.broadcast %cst_5 : f32 to vector<32x1xf32>
    %8 = arith.subf %7, %1 : vector<32x1xf32>
    %9 = arith.mulf %8, %4 : vector<32x1xf32>
    %c0_6 = arith.constant 0 : index
    %c0_7 = arith.constant 0 : index
    %10 = vector.load %arg8[%c0_6, %c0_7] : memref<1x32xf32, #tpu.memory_space<vmem>>, vector<1x32xf32>
    %11 = vector.broadcast %6 : vector<32x1xf32> to vector<32x32xf32>
    %12 = vector.broadcast %10 : vector<1x32xf32> to vector<32x32xf32>
    %13 = arith.mulf %11, %12 : vector<32x32xf32>
    %c0_8 = arith.constant 0 : index
    %c0_9 = arith.constant 0 : index
    %14 = vector.load %arg9[%c0_8, %c0_9] : memref<1x32xf32, #tpu.memory_space<vmem>>, vector<1x32xf32>
    %15 = vector.broadcast %14 : vector<1x32xf32> to vector<32x32xf32>
    %16 = arith.addf %13, %15 : vector<32x32xf32>
    %cst_10 = arith.constant 0.000000e+00 : f32
    %17 = vector.broadcast %cst_10 : f32 to vector<32x32xf32>
    %18 = arith.maximumf %16, %17 : vector<32x32xf32>
    %19 = arith.truncf %18 : vector<32x32xf32> to vector<32x32xbf16>
    %c0_11 = arith.constant 0 : index
    %c0_12 = arith.constant 0 : index
    %20 = vector.load %arg10[%c0_11, %c0_12] : memref<32x32xbf16, #tpu.memory_space<vmem>>, vector<32x32xbf16>
    %cst_13 = arith.constant dense<0.000000e+00> : vector<32x32xf32>
    %21 = tpu.matmul %19, %20, %cst_13 {dimension_numbers = #tpu.dot_dimension_numbers<[1], [0], [0], [1], [0, 0, 1, 1], [], []>} : vector<32x32xbf16>, vector<32x32xbf16>, vector<32x32xf32> -> vector<32x32xf32>
    %c0_14 = arith.constant 0 : index
    %c0_15 = arith.constant 0 : index
    %22 = vector.load %arg11[%c0_14, %c0_15] : memref<1x32xf32, #tpu.memory_space<vmem>>, vector<1x32xf32>
    %23 = vector.broadcast %22 : vector<1x32xf32> to vector<32x32xf32>
    %24 = arith.addf %21, %23 : vector<32x32xf32>
    %c0_16 = arith.constant 0 : index
    %c0_17 = arith.constant 0 : index
    %25 = vector.load %arg7[%c0_16, %c0_17] : memref<32x32xf32, #tpu.memory_space<vmem>>, vector<32x32xf32>
    %26 = arith.mulf %24, %25 : vector<32x32xf32>
    %27 = tpu.iota {dimensions = array<i32: 1>} : vector<32x9xi32>
    %c0_18 = arith.constant 0 : index
    %c0_19 = arith.constant 0 : index
    %28 = vector.load %arg3[%c0_18, %c0_19] : memref<32x1xi32, #tpu.memory_space<vmem>>, vector<32x1xi32>
    %29 = vector.broadcast %28 : vector<32x1xi32> to vector<32x9xi32>
    %30 = arith.cmpi eq, %29, %27 : vector<32x9xi32>
    %31 = arith.extui %30 : vector<32x9xi1> to vector<32x9xi32>
    %32 = arith.sitofp %31 : vector<32x9xi32> to vector<32x9xf32>
    %33 = arith.truncf %32 : vector<32x9xf32> to vector<32x9xbf16>
    %c0_20 = arith.constant 0 : index
    %c0_21 = arith.constant 0 : index
    %34 = vector.load %arg4[%c0_20, %c0_21] : memref<32x1xi32, #tpu.memory_space<vmem>>, vector<32x1xi32>
    %35 = vector.broadcast %34 : vector<32x1xi32> to vector<32x9xi32>
    %36 = arith.cmpi eq, %35, %27 : vector<32x9xi32>
    %37 = arith.extui %36 : vector<32x9xi1> to vector<32x9xi32>
    %38 = arith.sitofp %37 : vector<32x9xi32> to vector<32x9xf32>
    %39 = arith.truncf %38 : vector<32x9xf32> to vector<32x9xbf16>
    %c0_22 = arith.constant 0 : index
    %c0_23 = arith.constant 0 : index
    %40 = vector.load %arg6[%c0_22, %c0_23] : memref<9x32xf32, #tpu.memory_space<vmem>>, vector<9x32xf32>
    %41 = arith.truncf %40 : vector<9x32xf32> to vector<9x32xbf16>
    %cst_24 = arith.constant dense<0.000000e+00> : vector<32x32xf32>
    %42 = tpu.matmul %33, %41, %cst_24 {dimension_numbers = #tpu.dot_dimension_numbers<[1], [0], [0], [1], [0, 0, 1, 1], [], []>} : vector<32x9xbf16>, vector<9x32xbf16>, vector<32x32xf32> -> vector<32x32xf32>
    %43 = arith.addf %42, %26 : vector<32x32xf32>
    %cst_25 = arith.constant 0.000000e+00 : f32
    %44 = vector.broadcast %cst_25 : f32 to vector<32x32xf32>
    %45 = arith.maximumf %43, %44 : vector<32x32xf32>
    %46 = arith.truncf %45 : vector<32x32xf32> to vector<32x32xbf16>
    %cst_26 = arith.constant dense<0.000000e+00> : vector<9x32xf32>
    %47 = tpu.matmul %39, %46, %cst_26 {dimension_numbers = #tpu.dot_dimension_numbers<[0], [0], [1], [1], [0, 1, 1, 1], [], []>} : vector<32x9xbf16>, vector<32x32xbf16>, vector<9x32xf32> -> vector<9x32xf32>
    %48 = arith.addf %47, %40 : vector<9x32xf32>
    %49 = arith.truncf %48 : vector<9x32xf32> to vector<9x32xbf16>
    %c0_27 = arith.constant 0 : index
    %c0_28 = arith.constant 0 : index
    %c0_29 = arith.constant 0 : index
    %50 = vector.load %arg12[%c0_27, %c0_28, %c0_29] : memref<2x32x32xbf16, #tpu.memory_space<vmem>>, vector<1x32x32xbf16>
    %51 = vector.shape_cast %50 : vector<1x32x32xbf16> to vector<32x32xbf16>
    %cst_30 = arith.constant dense<0.000000e+00> : vector<9x32xf32>
    %52 = tpu.matmul %49, %51, %cst_30 {dimension_numbers = #tpu.dot_dimension_numbers<[1], [0], [0], [1], [0, 0, 1, 1], [], []>} : vector<9x32xbf16>, vector<32x32xbf16>, vector<9x32xf32> -> vector<9x32xf32>
    %c0_31 = arith.constant 0 : index
    %c0_32 = arith.constant 0 : index
    %c0_33 = arith.constant 0 : index
    %53 = vector.load %arg13[%c0_31, %c0_32, %c0_33] : memref<2x1x32xf32, #tpu.memory_space<vmem>>, vector<1x1x32xf32>
    %54 = vector.shape_cast %53 : vector<1x1x32xf32> to vector<1x32xf32>
    %55 = vector.broadcast %54 : vector<1x32xf32> to vector<9x32xf32>
    %56 = arith.addf %52, %55 : vector<9x32xf32>
    %cst_34 = arith.constant 0.000000e+00 : f32
    %57 = vector.broadcast %cst_34 : f32 to vector<9x32xf32>
    %58 = arith.maximumf %56, %57 : vector<9x32xf32>
    %59 = arith.truncf %58 : vector<9x32xf32> to vector<9x32xbf16>
    %c0_35 = arith.constant 0 : index
    %c0_36 = arith.constant 0 : index
    %c0_37 = arith.constant 0 : index
    %60 = vector.load %arg14[%c0_35, %c0_36, %c0_37] : memref<2x32x32xbf16, #tpu.memory_space<vmem>>, vector<1x32x32xbf16>
    %61 = vector.shape_cast %60 : vector<1x32x32xbf16> to vector<32x32xbf16>
    %cst_38 = arith.constant dense<0.000000e+00> : vector<9x32xf32>
    %62 = tpu.matmul %59, %61, %cst_38 {dimension_numbers = #tpu.dot_dimension_numbers<[1], [0], [0], [1], [0, 0, 1, 1], [], []>} : vector<9x32xbf16>, vector<32x32xbf16>, vector<9x32xf32> -> vector<9x32xf32>
    %c0_39 = arith.constant 0 : index
    %c0_40 = arith.constant 0 : index
    %c0_41 = arith.constant 0 : index
    %63 = vector.load %arg15[%c0_39, %c0_40, %c0_41] : memref<2x1x32xf32, #tpu.memory_space<vmem>>, vector<1x1x32xf32>
    %64 = vector.shape_cast %63 : vector<1x1x32xf32> to vector<1x32xf32>
    %65 = vector.broadcast %64 : vector<1x32xf32> to vector<9x32xf32>
    %66 = arith.addf %62, %65 : vector<9x32xf32>
    %cst_42 = arith.constant 0.000000e+00 : f32
    %67 = vector.broadcast %cst_42 : f32 to vector<9x32xf32>
    %68 = arith.maximumf %66, %67 : vector<9x32xf32>
    %69 = arith.truncf %68 : vector<9x32xf32> to vector<9x32xbf16>
    %cst_43 = arith.constant dense<0.000000e+00> : vector<32x32xf32>
    %70 = tpu.matmul %33, %69, %cst_43 {dimension_numbers = #tpu.dot_dimension_numbers<[1], [0], [0], [1], [0, 0, 1, 1], [], []>} : vector<32x9xbf16>, vector<9x32xbf16>, vector<32x32xf32> -> vector<32x32xf32>
    %71 = arith.addf %70, %26 : vector<32x32xf32>
    %cst_44 = arith.constant 0.000000e+00 : f32
    %72 = vector.broadcast %cst_44 : f32 to vector<32x32xf32>
    %73 = arith.maximumf %71, %72 : vector<32x32xf32>
    %74 = arith.truncf %73 : vector<32x32xf32> to vector<32x32xbf16>
    %cst_45 = arith.constant dense<0.000000e+00> : vector<9x32xf32>
    %75 = tpu.matmul %39, %74, %cst_45 {dimension_numbers = #tpu.dot_dimension_numbers<[0], [0], [1], [1], [0, 1, 1, 1], [], []>} : vector<32x9xbf16>, vector<32x32xbf16>, vector<9x32xf32> -> vector<9x32xf32>
    %76 = arith.addf %75, %68 : vector<9x32xf32>
    %77 = arith.truncf %76 : vector<9x32xf32> to vector<9x32xbf16>
    %c1 = arith.constant 1 : index
    %c0_46 = arith.constant 0 : index
    %c0_47 = arith.constant 0 : index
    %78 = vector.load %arg12[%c1, %c0_46, %c0_47] : memref<2x32x32xbf16, #tpu.memory_space<vmem>>, vector<1x32x32xbf16>
    %79 = vector.shape_cast %78 : vector<1x32x32xbf16> to vector<32x32xbf16>
    %cst_48 = arith.constant dense<0.000000e+00> : vector<9x32xf32>
    %80 = tpu.matmul %77, %79, %cst_48 {dimension_numbers = #tpu.dot_dimension_numbers<[1], [0], [0], [1], [0, 0, 1, 1], [], []>} : vector<9x32xbf16>, vector<32x32xbf16>, vector<9x32xf32> -> vector<9x32xf32>
    %c1_49 = arith.constant 1 : index
    %c0_50 = arith.constant 0 : index
    %c0_51 = arith.constant 0 : index
    %81 = vector.load %arg13[%c1_49, %c0_50, %c0_51] : memref<2x1x32xf32, #tpu.memory_space<vmem>>, vector<1x1x32xf32>
    %82 = vector.shape_cast %81 : vector<1x1x32xf32> to vector<1x32xf32>
    %83 = vector.broadcast %82 : vector<1x32xf32> to vector<9x32xf32>
    %84 = arith.addf %80, %83 : vector<9x32xf32>
    %cst_52 = arith.constant 0.000000e+00 : f32
    %85 = vector.broadcast %cst_52 : f32 to vector<9x32xf32>
    %86 = arith.maximumf %84, %85 : vector<9x32xf32>
    %87 = arith.truncf %86 : vector<9x32xf32> to vector<9x32xbf16>
    %c1_53 = arith.constant 1 : index
    %c0_54 = arith.constant 0 : index
    %c0_55 = arith.constant 0 : index
    %88 = vector.load %arg14[%c1_53, %c0_54, %c0_55] : memref<2x32x32xbf16, #tpu.memory_space<vmem>>, vector<1x32x32xbf16>
    %89 = vector.shape_cast %88 : vector<1x32x32xbf16> to vector<32x32xbf16>
    %cst_56 = arith.constant dense<0.000000e+00> : vector<9x32xf32>
    %90 = tpu.matmul %87, %89, %cst_56 {dimension_numbers = #tpu.dot_dimension_numbers<[1], [0], [0], [1], [0, 0, 1, 1], [], []>} : vector<9x32xbf16>, vector<32x32xbf16>, vector<9x32xf32> -> vector<9x32xf32>
    %c1_57 = arith.constant 1 : index
    %c0_58 = arith.constant 0 : index
    %c0_59 = arith.constant 0 : index
    %91 = vector.load %arg15[%c1_57, %c0_58, %c0_59] : memref<2x1x32xf32, #tpu.memory_space<vmem>>, vector<1x1x32xf32>
    %92 = vector.shape_cast %91 : vector<1x1x32xf32> to vector<1x32xf32>
    %93 = vector.broadcast %92 : vector<1x32xf32> to vector<9x32xf32>
    %94 = arith.addf %90, %93 : vector<9x32xf32>
    %95 = arith.truncf %94 : vector<9x32xf32> to vector<9x32xbf16>
    %cst_60 = arith.constant dense<0.000000e+00> : vector<32x32xf32>
    %96 = tpu.matmul %33, %95, %cst_60 {dimension_numbers = #tpu.dot_dimension_numbers<[1], [0], [0], [1], [0, 0, 1, 1], [], []>} : vector<32x9xbf16>, vector<9x32xbf16>, vector<32x32xf32> -> vector<32x32xf32>
    %cst_61 = arith.constant dense<0.000000e+00> : vector<32x32xf32>
    %97 = tpu.matmul %39, %95, %cst_61 {dimension_numbers = #tpu.dot_dimension_numbers<[1], [0], [0], [1], [0, 0, 1, 1], [], []>} : vector<32x9xbf16>, vector<9x32xbf16>, vector<32x32xf32> -> vector<32x32xf32>
    %98 = arith.mulf %96, %97 : vector<32x32xf32>
    %99 = arith.truncf %98 : vector<32x32xf32> to vector<32x32xbf16>
    %c0_62 = arith.constant 0 : index
    %c0_63 = arith.constant 0 : index
    %100 = vector.load %arg16[%c0_62, %c0_63] : memref<32x32xbf16, #tpu.memory_space<vmem>>, vector<32x32xbf16>
    %cst_64 = arith.constant dense<0.000000e+00> : vector<32x32xf32>
    %101 = tpu.matmul %99, %100, %cst_64 {dimension_numbers = #tpu.dot_dimension_numbers<[1], [0], [0], [1], [0, 0, 1, 1], [], []>} : vector<32x32xbf16>, vector<32x32xbf16>, vector<32x32xf32> -> vector<32x32xf32>
    %102 = arith.truncf %26 : vector<32x32xf32> to vector<32x32xbf16>
    %c0_65 = arith.constant 0 : index
    %c0_66 = arith.constant 0 : index
    %103 = vector.load %arg17[%c0_65, %c0_66] : memref<32x32xbf16, #tpu.memory_space<vmem>>, vector<32x32xbf16>
    %cst_67 = arith.constant dense<0.000000e+00> : vector<32x32xf32>
    %104 = tpu.matmul %102, %103, %cst_67 {dimension_numbers = #tpu.dot_dimension_numbers<[1], [0], [0], [1], [0, 0, 1, 1], [], []>} : vector<32x32xbf16>, vector<32x32xbf16>, vector<32x32xf32> -> vector<32x32xf32>
    %105 = arith.addf %101, %104 : vector<32x32xf32>
    %c0_68 = arith.constant 0 : index
    %c0_69 = arith.constant 0 : index
    %106 = vector.load %arg18[%c0_68, %c0_69] : memref<1x32xf32, #tpu.memory_space<vmem>>, vector<1x32xf32>
    %107 = vector.broadcast %106 : vector<1x32xf32> to vector<32x32xf32>
    %108 = arith.addf %105, %107 : vector<32x32xf32>
    %cst_70 = arith.constant 0.000000e+00 : f32
    %109 = vector.broadcast %cst_70 : f32 to vector<32x32xf32>
    %110 = arith.maximumf %108, %109 : vector<32x32xf32>
    %111 = arith.truncf %110 : vector<32x32xf32> to vector<32x32xbf16>
    %c0_71 = arith.constant 0 : index
    %c0_72 = arith.constant 0 : index
    %112 = vector.load %arg19[%c0_71, %c0_72] : memref<32x16xbf16, #tpu.memory_space<vmem>>, vector<32x16xbf16>
    %cst_73 = arith.constant dense<0.000000e+00> : vector<32x16xf32>
    %113 = tpu.matmul %111, %112, %cst_73 {dimension_numbers = #tpu.dot_dimension_numbers<[1], [0], [0], [1], [0, 0, 1, 1], [], []>} : vector<32x32xbf16>, vector<32x16xbf16>, vector<32x16xf32> -> vector<32x16xf32>
    %c0_74 = arith.constant 0 : index
    %c0_75 = arith.constant 0 : index
    %114 = vector.load %arg20[%c0_74, %c0_75] : memref<1x16xf32, #tpu.memory_space<vmem>>, vector<1x16xf32>
    %115 = vector.broadcast %114 : vector<1x16xf32> to vector<32x16xf32>
    %116 = arith.addf %113, %115 : vector<32x16xf32>
    %cst_76 = arith.constant 0.000000e+00 : f32
    %117 = vector.broadcast %cst_76 : f32 to vector<32x16xf32>
    %118 = arith.maximumf %116, %117 : vector<32x16xf32>
    %c0_77 = arith.constant 0 : index
    %c0_78 = arith.constant 0 : index
    %119 = vector.load %arg21[%c0_77, %c0_78] : memref<1x16xf32, #tpu.memory_space<vmem>>, vector<1x16xf32>
    %120 = vector.broadcast %119 : vector<1x16xf32> to vector<32x16xf32>
    %121 = arith.mulf %118, %120 : vector<32x16xf32>
    %cst_79 = arith.constant dense<0.000000e+00> : vector<32xf32>
    %122 = vector.multi_reduction <add>, %121, %cst_79 [1] : vector<32x16xf32> to vector<32xf32>
    %123 = vector.shape_cast %122 : vector<32xf32> to vector<32x1xf32>
    %c0_80 = arith.constant 0 : index
    %c0_81 = arith.constant 0 : index
    %124 = vector.load %arg22[%c0_80, %c0_81] : memref<1x1xf32, #tpu.memory_space<vmem>>, vector<1x1xf32>
    %125 = vector.broadcast %124 : vector<1x1xf32> to vector<32x1xf32>
    %126 = arith.addf %123, %125 : vector<32x1xf32>
    %127 = arith.mulf %126, %4 : vector<32x1xf32>
    %128 = arith.subf %127, %9 : vector<32x1xf32>
    %129 = arith.mulf %128, %128 : vector<32x1xf32>
    %cst_82 = arith.constant 5.000000e-01 : f32
    %130 = vector.broadcast %cst_82 : f32 to vector<32x1xf32>
    %131 = arith.mulf %130, %129 : vector<32x1xf32>
    %132 = arith.mulf %2, %2 : vector<32x1xf32>
    %133 = arith.mulf %131, %132 : vector<32x1xf32>
    %134 = tpu.iota {dimensions = array<i32: 1>} : vector<32x128xi32>
    %c0_83 = arith.constant 0 : index
    %c0_84 = arith.constant 0 : index
    %135 = vector.load %arg5[%c0_83, %c0_84] : memref<32x1xi32, #tpu.memory_space<vmem>>, vector<32x1xi32>
    %136 = vector.broadcast %135 : vector<32x1xi32> to vector<32x128xi32>
    %137 = arith.cmpi eq, %136, %134 : vector<32x128xi32>
    %138 = arith.extui %137 : vector<32x128xi1> to vector<32x128xi32>
    %139 = arith.sitofp %138 : vector<32x128xi32> to vector<32x128xf32>
    %140 = vector.broadcast %133 : vector<32x1xf32> to vector<32x128xf32>
    %141 = arith.mulf %140, %139 : vector<32x128xf32>
    %cst_85 = arith.constant dense<0.000000e+00> : vector<128xf32>
    %142 = vector.multi_reduction <add>, %141, %cst_85 [0] : vector<32x128xf32> to vector<128xf32>
    %143 = vector.shape_cast %142 : vector<128xf32> to vector<1x128xf32>
    %c0_86 = arith.constant 0 : index
    %c0_87 = arith.constant 0 : index
    %144 = vector.load %arg23[%c0_86, %c0_87] : memref<1x128xf32, #tpu.memory_space<vmem>>, vector<1x128xf32>
    tpu.vector_store %arg23[%c0_86, %c0_87], %143 {strides = array<i32>} : memref<1x128xf32, #tpu.memory_space<vmem>>, vector<1x128xf32>,
    return
  }
}

</mosaic_0001>

<bundles_post_ra>
// kernel: tpu_custom_call.1
= control target key start
LH: loop header
LB: loop body
LE: loop exit
PB: predicated region body
PF: predicated region fallthrough
CT: control target
= control target key end

     0   :  { %s1594_s0 = inlined_call_operand.vmem [shape: f32[32,1], index: 0, kind: input, shape index: {}]   ;;  %s1595_s1 = inlined_call_operand.vmem [shape: f32[32,1], index: 1, kind: input, shape index: {}]   ;;  %s1596_s2 = inlined_call_operand.vmem [shape: f32[32,1], index: 2, kind: input, shape index: {}]   ;;  %s1597_s3 = inlined_call_operand.vmem [shape: s32[32,1], index: 3, kind: input, shape index: {}]   ;;  %s1598_s4 = inlined_call_operand.vmem [shape: s32[32,1], index: 4, kind: input, shape index: {}]   ;;  %s1599_s5 = inlined_call_operand.vmem [shape: s32[32,1], index: 5, kind: input, shape index: {}]   ;;  %s1600_s6 = inlined_call_operand.vmem [shape: f32[9,32], index: 6, kind: input, shape index: {}]   ;;  %s1601_s7 = inlined_call_operand.vmem [shape: f32[32,32], index: 7, kind: input, shape index: {}]   ;;  %s1602_s8 = inlined_call_operand.vmem [shape: f32[1,32], index: 8, kind: input, shape index: {}]   ;;  %s1603_s9 = inlined_call_operand.vmem [shape: f32[1,32], index: 9, kind: input, shape index: {}]   ;;  %s1604_s10 = inlined_call_operand.vmem [shape: bf16[32,32], index: 10, kind: input, shape index: {}]   ;;  %s1605_s11 = inlined_call_operand.vmem [shape: f32[1,32], index: 11, kind: input, shape index: {}]   ;;  %s1606_s12 = inlined_call_operand.vmem [shape: bf16[2,32,32], index: 12, kind: input, shape index: {}]   ;;  %s1607_s13 = inlined_call_operand.vmem [shape: f32[2,1,32], index: 13, kind: input, shape index: {}]   ;;  %s1608_s14 = inlined_call_operand.vmem [shape: bf16[2,32,32], index: 14, kind: input, shape index: {}]   ;;  %s1609_s15 = inlined_call_operand.vmem [shape: f32[2,1,32], index: 15, kind: input, shape index: {}]   ;;  %s1610_s16 = inlined_call_operand.vmem [shape: bf16[32,32], index: 16, kind: input, shape index: {}]   ;;  %s1611_s17 = inlined_call_operand.vmem [shape: bf16[32,32], index: 17, kind: input, shape index: {}]   ;;  %s1612_s18 = inlined_call_operand.vmem [shape: f32[1,32], index: 18, kind: input, shape index: {}]   ;;  %s1613_s19 = inlined_call_operand.vmem [shape: bf16[32,16], index: 19, kind: input, shape index: {}]   ;;  %s1614_s20 = inlined_call_operand.vmem [shape: f32[1,16], index: 20, kind: input, shape index: {}]   ;;  %s1615_s21 = inlined_call_operand.vmem [shape: f32[1,16], index: 21, kind: input, shape index: {}]   ;;  %s1616_s22 = inlined_call_operand.<no memory space> [shape: f32[1,1], index: 22, kind: input, shape index: {}]   ;;  %s1617_s23 = inlined_call_operand.hbm [shape: f32[1,128], index: 23, kind: output, shape index: {}]  }
   0x1   :  { %1626 = sst [smem:[#allocation6_spill]] %s1594_s0  ;;  %v28_v0 = vstv %s1616_s22 }
   0x2   :  { %1627 = sst [smem:[#allocation7_spill]] %s1595_s1  ;;  %29 = vst [vmem:[#allocation2] sm:$0x1] %v28_v0 }
   0x3   :  { %1628 = sst [smem:[#allocation8_spill]] %s1596_s2 }
   0x4   :  { %1629 = sst [smem:[#allocation9_spill]] %s1597_s3 }
   0x5   :  { %1630 = sst [smem:[#allocation10_spill]] %s1598_s4 }
   0x6   :  { %1631 = sst [smem:[#allocation11_spill]] %s1599_s5 }
   0x7   :  { %1632 = sst [smem:[#allocation12_spill]] %s1600_s6 }
   0x8   :  { %1633 = sst [smem:[#allocation13_spill]] %s1601_s7 }
   0x9   :  { %s1634_s5 = sld [smem:[#allocation9_spill]]  ;;  %v1113_v3 = vmov 0  }
   0xa   :  { %s1635_s2 = sld [smem:[#allocation7_spill]]  ;;  %1067 = vset.pattern.permute.xlu2 %v1113_v3  ;;  %1066 = vset.pattern.permute.xlu1 %v1113_v3 }
   0xb   :  { %s1636_s7 = sld [smem:[#allocation6_spill]]  ;;  %1065 = vset.pattern.permute.xlu0 %v1113_v3 }
   0xc   :  { %s1637_s22 = sld [smem:[#allocation8_spill]] }
   0xf   :  { %v266_v1 = vld [vmem:[%s1634_s5 + $0x10] sm:$0xff]  ;;  %v267_v17 = vld [vmem:[%s1634_s5 + $0x18] sm:$0xff] }
  0x10   :  { %v1246_v2 = vld [vmem:[%s1635_s2 + $0x10] sm:$0xff]  ;;  %v1259_v6 = vld [vmem:[%s1635_s2] sm:$0xff]  ;;  %275 = vperm.xlu2 %1067, %v266_v1   ;;  %v1276_v11 = vld [vmem:[%s1635_s2 + $0x18] sm:$0xff] }
  0x11   :  { %v80_v4 = vld [vmem:[%s1636_s7 + $0x10] sm:$0xff]  ;;  %v78_v8 = vld [vmem:[%s1636_s7] sm:$0xff]  ;;  %v1286_v14 = vld [vmem:[%s1635_s2 + $0x8] sm:$0xff] }
  0x12   :  { %v1254_v5 = vld [vmem:[%s1637_s22 + $0x10] sm:$0xff]  ;;  %v1269_v9 = vld [vmem:[%s1637_s22] sm:$0xff]  ;;  %v1281_v12 = vld [vmem:[%s1637_s22 + $0x18] sm:$0xff] }
  0x13   :  { %v152_v7 = vmul.f32 %v1254_v5, %v1246_v2  ;;  %v150_v10 = vmul.f32 %v1269_v9, %v1259_v6  ;;  %v1291_v15 = vld [vmem:[%s1637_s22 + $0x8] sm:$0xff]  ;;  %v153_v18 = vmul.f32 %v1281_v12, %v1276_v11  ;;  %v81_v19 = vld [vmem:[%s1636_s7 + $0x18] sm:$0xff] }
  0x14   :  { %v151_v20 = vmul.f32 %v1291_v15, %v1286_v14  ;;  %v79_v21 = vld [vmem:[%s1636_s7 + $0x8] sm:$0xff] }
  0x15   :  { %v156_v13 = vadd.f32 %v152_v7, %v80_v4  ;;  %v154_v16 = vadd.f32 %v150_v10, %v78_v8  ;;  %v157_v22 = vadd.f32 %v153_v18, %v81_v19 }
  0x16   :  { %v155_v23 = vadd.f32 %v151_v20, %v79_v21 }
  0x17   :  { %179 = vperm.xlu1 %1066, %v156_v13   ;;  %169 = vperm.xlu0 %1065, %v154_v16  }
  0x18   :  { %278 = vperm.xlu2 %1067, %v267_v17  }
  0x19   :  { %30 = vsyncpa [#allocation4], 0  ;;  %s1638_s6 = sld [smem:[#allocation10_spill]]  ;;  %v265_v25 = vld [vmem:[%s1634_s5 + $0x8] sm:$0xff]  ;;  %v264_v26 = vld [vmem:[%s1634_s5] sm:$0xff]  ;;  %vm334_vm0 = vcmask 1043456   ;;  %v262_v37 = vlaneseq  ;;  %1079 = vrcp.f32 %v1269_v9  ;;  %vm95_vm13 = vweird.f32 %v1269_v9 }
  0x1a   :  { %s1639_s5 = sld [smem:[#allocation11_spill]]  ;;  %vm335_vm1 = vcmask 1044480   ;;  %v1114_v35 = vmov 65535   ;;  %v1045_v42 = vld [vmem:[%s1604_s10 + $0x8] sm:$0xff]  ;;  %v1115_v43 = vmov 0.0   ;;  %v1044_v46 = vld [vmem:[%s1604_s10] sm:$0xff]  ;;  %1081 = vrcp.f32 %v1291_v15 }
  0x1b   :  { %s1640_s29 = sld [smem:[#allocation12_spill]]  ;;  %v336_v36 = vsel %vm334_vm0, 4294967295, %v1114_v35  ;;  %v1345_v41 = vand.u32 127, %v262_v37  ;;  %241 = vmatpush.bf16.msra.mxu0 %v1045_v42  ;;  %vm327_vm4 = vcmask 72704   ;;  %v1068_v51 = vld [vmem:[%s1602_s8] ss:$0 sm:$0xff]  ;;  %1083 = vrcp.f32 %v1254_v5 }
  0x1c   :  { %v1342_v38 = vsel %vm335_vm1, %v336_v36, 0  ;;  %v1069_v52 = vld [vmem:[%s1603_s9] ss:$0 sm:$0xff]  ;;  %vm228_vm5 = vcmask 261120   ;;  %s1641_s28 = sld [smem:[#allocation13_spill]]  ;;  %vm813_vm12 = vcmask 130048   ;;  %1085 = vrcp.f32 %v1281_v12 }
  0x1d   :  { %v1070_v35 = vld [vmem:[%s1605_s11] ss:$0 sm:$0xff]  ;;  %vm110_vm1 = vweird.f32 %v1291_v15  ;;  %s927_s0 = sshll.u32 %s1617_s23, 4  ;;  %s928_s0 = int_to_ptr.hbm [resolvable:$true] %s927_s0 }
  0x1f   :  { %184 = vperm.xlu1 %1066, %v157_v22   ;;  %174 = vperm.xlu0 %1065, %v155_v23   ;;  %v294_v24 = vld [vmem:[%s1638_s6] sm:$0xff]  ;;  %v297_v27 = vld [vmem:[%s1638_s6 + $0x18] sm:$0xff]  ;;  %v296_v28 = vld [vmem:[%s1638_s6 + $0x10] sm:$0xff] }
  0x20   :  { %299 = vperm.xlu2 %1067, %v294_v24   ;;  %v295_v29 = vld [vmem:[%s1638_s6 + $0x8] sm:$0xff]  ;;  %v858_v30 = vld [vmem:[%s1639_s5] sm:$0xff]  ;;  %v860_v31 = vld [vmem:[%s1639_s5 + $0x10] sm:$0xff]  ;;  %242 = vmatpush.bf16.msra.mxu0 %v1044_v46 }
  0x21   :  { %v1333_v32 = vld [vmem:[%s1640_s29] sm:$0xff]  ;;  %v1338_v33 = vld [vmem:[%s1640_s29 + $0x8] sm:$0x1] }
  0x22   :  { %v326_v34 = vpack.c.bf16 %v1338_v33, %v1333_v32  ;;  %v255_v42 = vld [vmem:[%s1641_s28 + $0x8] sm:$0xff]  ;;  %v254_v46 = vld [vmem:[%s1641_s28] sm:$0xff] }
  0x24   :  { %v339_v39 = vand.u32 %v1342_v38, %v326_v34 }
  0x26   :  { %1060 = vmatpush.bf16.msra.mxu2 %v339_v39  ;;  %348 = vmatpush.bf16.msra.mxu1 %v339_v39  ;;  %v256_v39 = vld [vmem:[%s1641_s28 + $0x10] sm:$0xff] }
  0x27   :  { %272 = vperm.xlu1 %1066, %v265_v25   ;;  %269 = vperm.xlu0 %1065, %v264_v26  }
  0x28   :  { %308 = vperm.xlu2 %1067, %v297_v27  }
  0x2f   :  { %305 = vperm.xlu1 %1066, %v296_v28   ;;  %302 = vperm.xlu0 %1065, %v295_v29  }
  0x30   :  { %863 = vperm.xlu2 %1067, %v858_v30   ;;  %v859_v30 = vld [vmem:[%s1639_s5 + $0x8] sm:$0xff] }
  0x37   :  { %869 = vperm.xlu1 %1066, %v860_v31  }
  0x6a   :  { %v276_v40 = vpop.permute.xlu2 %275 }
  0x6b   :  { %vm282_vm2 = vcmp.eq.s32.totalorder %v276_v40, %v1345_v41 }
  0x6c   :  { %v948_v44 = vsel %vm282_vm2, 1.0, %v1115_v43 }
  0x72   :  { %v279_v45 = vpop.permute.xlu2 %278 }
  0x73   :  { %vm283_vm3 = vcmp.eq.s32.totalorder %v279_v45, %v1345_v41 }
  0x74   :  { %v949_v47 = vsel %vm283_vm3, 1.0, %v1115_v43 }
  0x75   :  { %v1357_v48 = vpack.c.bf16 %v949_v47, %v948_v44 }
  0x77   :  { %955 = vmatmul.msk.bf16.vlgmr.msra.gmra.mxu2 %vm327_vm4, %v1357_v48 }
  0x7a   :  { %v300_v8 = vpop.permute.xlu2 %299 }
  0x7b   :  { %vm310_vm8 = vcmp.eq.s32.totalorder %v300_v8, %v1345_v41  ;;  %v1046_v8 = vld [vmem:[%s1606_s12] sm:$0xff] }
  0x7c   :  { %v950_v17 = vsel %vm310_vm8, 1.0, %v1115_v43 }
  0x82   :  { %v309_v24 = vpop.permute.xlu2 %308 }
  0x83   :  { %vm313_vm11 = vcmp.eq.s32.totalorder %v309_v24, %v1345_v41 }
  0x84   :  { %v953_v26 = vsel %vm313_vm11, 1.0, %v1115_v43 }
  0x89   :  { %v180_v49 = vpop.permute.xlu1 %179  ;;  %v170_v50 = vpop.permute.xlu0 %169 }
  0x8a   :  { %v190_v53 = vmul.f32 %v1068_v51, %v170_v50  ;;  %v192_v3 = vmul.f32 %v1068_v51, %v180_v49  ;;  %v257_v49 = vld [vmem:[%s1641_s28 + $0x18] sm:$0xff] }
  0x8c   :  { %v198_v56 = vadd.f32 %v1069_v52, %v190_v53  ;;  %v200_v10 = vadd.f32 %v1069_v52, %v192_v3 }
  0x8e   :  { %v202_v59 = vmax.f32 %v198_v56, 0.0  ;;  %v204_v19 = vmax.f32 %v200_v10, 0.0 }
  0x91   :  { %v185_v54 = vpop.permute.xlu1 %184  ;;  %v175_v55 = vpop.permute.xlu0 %174 }
  0x92   :  { %v191_v57 = vmul.f32 %v1068_v51, %v175_v55  ;;  %v193_v4 = vmul.f32 %v1068_v51, %v185_v54 }
  0x94   :  { %v199_v58 = vadd.f32 %v1069_v52, %v191_v57  ;;  %v201_v13 = vadd.f32 %v1069_v52, %v193_v4  ;;  %v1047_v4 = vld [vmem:[%s1606_s12 + $0x8] sm:$0xff] }
  0x95   :  { %429 = vmatpush.bf16.msra.mxu3 %v1047_v4 }
  0x96   :  { %v203_v60 = vmax.f32 %v199_v58, 0.0  ;;  %v205_v20 = vmax.f32 %v201_v13, 0.0 }
  0x98   :  { %v206_v62 = vpack.c.bf16 %v203_v60, %v202_v59  ;;  %v207_v22 = vpack.c.bf16 %v205_v20, %v204_v19  ;;  %v1049_v19 = vld [vmem:[%s1608_s14 + $0x8] sm:$0xff]  ;;  %v1048_v20 = vld [vmem:[%s1608_s14] sm:$0xff] }
  0x99   :  { %v273_v61 = vpop.permute.xlu1 %272  ;;  %v270_v63 = vpop.permute.xlu0 %269  ;;  %430 = vmatpush.bf16.msra.mxu3 %v1046_v8 }
  0x9a   :  { %vm281_vm6 = vcmp.eq.s32.totalorder %v273_v61, %v1345_v41  ;;  %vm280_vm7 = vcmp.eq.s32.totalorder %v270_v63, %v1345_v41  ;;  %944 = vmatmul.msk.bf16.vlgmr.msra.gmra.mxu0 %vm228_vm5, %v206_v62 }
  0x9b   :  { %v947_v0 = vsel %vm281_vm6, 1.0, %v1115_v43  ;;  %v946_v1 = vsel %vm280_vm7, 1.0, %v1115_v43 }
  0x9c   :  { %v1372_v7 = vpack.c.bf16 %v947_v0, %v946_v1 }
  0x9e   :  { %954 = vmatmul.msk.bf16.vlgmr.msra.gmra.mxu1 %vm327_vm4, %v1372_v7 }
  0xa1   :  { %v303_v16 = vpop.permute.xlu0 %302  ;;  %v306_v23 = vpop.permute.xlu1 %305 }
  0xa2   :  { %vm311_vm9 = vcmp.eq.s32.totalorder %v303_v16, %v1345_v41  ;;  %vm312_vm10 = vcmp.eq.s32.totalorder %v306_v23, %v1345_v41 }
  0xa3   :  { %v951_v18 = vsel %vm311_vm9, 1.0, %v1115_v43  ;;  %v952_v25 = vsel %vm312_vm10, 1.0, %v1115_v43  ;;  %vm140_vm9 = vweird.f32 %v1281_v12 }
  0xa4   :  { %v1380_v21 = vpack.c.bf16 %v951_v18, %v950_v17  ;;  %v1388_v27 = vpack.c.bf16 %v953_v26, %v952_v25 }
  0xa6   :  { %366 = vxpose.xlu0.c.b16.start [1/2] (short) (narrow) %v1380_v21, 16 }
  0xaa   :  { %945 = vmatmul.msk.bf16.gmra.mxu0 %vm228_vm5, %v207_v22 }
  0xb6   :  { %367 = vxpose.xlu0.c.b16.end [2/2] (short) (narrow) %v1388_v27, 16 }
  0xfa   :  { %v355_v36 = vpop.f32.mrf.mxu2 }
 0x102   :  { %v357_v56 = vpop.f32.mrf.mxu2 }
 0x117   :  { %v244_v28 = vpop.f32.mrf.mxu0 }
 0x118   :  { %v245_v44 = vadd.f32 %v1070_v35, %v244_v28 }
 0x11a   :  { %v1413_v53 = vmul.f32 %v254_v46, %v245_v44  ;;  %v1051_v44 = vld [vmem:[%s1606_s12 + $0x18] sm:$0xff] }
 0x11b   :  { %v350_v31 = vpop.f32.mrf.mxu1  ;;  %554 = vmatpush.bf16.msrb.mxu0 %v1051_v44 }
 0x11c   :  { %v351_v59 = vadd.f32 %v350_v31, %v1413_v53 }
 0x11e   :  { %v360_v0 = vmax.f32 %v351_v59, 0.0 }
 0x11f   :  { %v246_v29 = vpop.f32.mrf.mxu0 }
 0x120   :  { %v247_v40 = vadd.f32 %v1070_v35, %v246_v29 }
 0x122   :  { %v1411_v50 = vmul.f32 %v255_v42, %v247_v40 }
 0x123   :  { %v352_v52 = vpop.f32.mrf.mxu1 }
 0x124   :  { %866 = vperm.xlu0 %1065, %v859_v30   ;;  %v353_v57 = vadd.f32 %v352_v52, %v1411_v50  ;;  %v1072_v30 = vld [vmem:[%s1609_s15] ss:$0 sm:$0xff] }
 0x126   :  { %v361_v62 = vmax.f32 %v353_v57, 0.0 }
 0x127   :  { %v249_v34 = vpop.f32.mrf.mxu0 }
 0x128   :  { %v250_v37 = vadd.f32 %v1070_v35, %v249_v34  ;;  %v364_v1 = vpack.c.bf16 %v361_v62, %v360_v0 }
 0x12a   :  { %v1403_v45 = vmul.f32 %v256_v39, %v250_v37 }
 0x12c   :  { %v356_v55 = vadd.f32 %v355_v36, %v1403_v45 }
 0x12e   :  { %v362_v60 = vmax.f32 %v356_v55, 0.0 }
 0x12f   :  { %v251_v47 = vpop.f32.mrf.mxu0 }
 0x130   :  { %v252_v51 = vadd.f32 %v1070_v35, %v251_v47 }
 0x132   :  { %v1415_v54 = vmul.f32 %v257_v49, %v252_v51 }
 0x134   :  { %v358_v58 = vadd.f32 %v357_v56, %v1415_v54 }
 0x136   :  { %v363_v61 = vmax.f32 %v358_v58, 0.0 }
 0x138   :  { %v365_v63 = vpack.c.bf16 %v363_v61, %v362_v60 }
 0x13a   :  { %391 = vmatpush.bf16.msrb.mxu2 %v365_v63  ;;  %v1050_v63 = vld [vmem:[%s1606_s12 + $0x10] sm:$0xff] }
 0x13b   :  { %555 = vmatpush.bf16.msrb.mxu0 %v1050_v63 }
 0x13e   :  { %392 = vmatpush.bf16.msrb.mxu2 %v364_v1 }
 0x142   :  { %469 = vmatpush.bf16.msra.mxu2 %v1049_v19  ;;  %v1073_v19 = vld [vmem:[%s1607_s13 + $0x1] ss:$0 sm:$0xff] }
 0x146   :  { %470 = vmatpush.bf16.msra.mxu2 %v1048_v20 }
 0x152   :  { %v374_v3 = vpop.trf.xlu0 }
 0x153   :  { %956 = vmatmul.msk.bf16.vlgmr.msrb.gmra.mxu2 %vm228_vm5, %v374_v3 }
 0x1d6   :  { %v394_v10 = vpop.f32.mrf.mxu2 }
 0x1d7   :  { %v395_v16 = vadd.f32 %v394_v10, %v1333_v32  ;;  %v1071_v32 = vld [vmem:[%s1607_s13] ss:$0 sm:$0xff] }
 0x1de   :  { %v396_v13 = vpop.f32.mrf.mxu2 }
 0x1df   :  { %v397_v17 = vadd.f32 %v396_v13, %v1338_v33  ;;  %v1053_v13 = vld [vmem:[%s1608_s14 + $0x18] sm:$0xff] }
 0x1e0   :  { %596 = vmatpush.bf16.msrb.mxu2 %v1053_v13 }
 0x1e1   :  { %v399_v18 = vpack.c.bf16 %v397_v17, %v395_v16  ;;  %v1057_v16 = vld [vmem:[%s1611_s17 + $0x8] sm:$0xff]  ;;  %v1056_v17 = vld [vmem:[%s1611_s17] sm:$0xff] }
 0x1e3   :  { %965 = vmatmul.msk.bf16.vlgmr.msra.gmra.mxu3 %vm228_vm5, %v399_v18 }
 0x266   :  { %v432_v22 = vpop.f32.mrf.mxu3 }
 0x267   :  { %v433_v23 = vadd.f32 %v1071_v32, %v432_v22 }
 0x269   :  { %v437_v25 = vmax.f32 %v433_v23, 0.0 }
 0x26e   :  { %v434_v33 = vpop.f32.mrf.mxu3 }
 0x26f   :  { %v435_v24 = vadd.f32 %v1071_v32, %v434_v33 }
 0x271   :  { %v438_v26 = vmax.f32 %v435_v24, 0.0 }
 0x273   :  { %v439_v28 = vpack.c.bf16 %v438_v26, %v437_v25  ;;  %v662_v25 = vpack.c.bf16 %v1411_v50, %v1413_v53  ;;  %v663_v26 = vpack.c.bf16 %v1415_v54, %v1403_v45 }
 0x275   :  { %974 = vmatmul.msk.bf16.vlgmr.msra.gmra.mxu2 %vm228_vm5, %v439_v28 }
 0x2f8   :  { %v472_v29 = vpop.f32.mrf.mxu2 }
 0x2f9   :  { %v473_v31 = vadd.f32 %v1072_v30, %v472_v29  ;;  %v1074_v29 = vld [vmem:[%s1609_s15 + $0x1] ss:$0 sm:$0xff] }
 0x2fb   :  { %v477_v36 = vmax.f32 %v473_v31, 0.0  ;;  %v1055_v31 = vld [vmem:[%s1610_s16 + $0x8] sm:$0xff] }
 0x300   :  { %v474_v34 = vpop.f32.mrf.mxu2 }
 0x301   :  { %v475_v35 = vadd.f32 %v1072_v30, %v474_v34 }
 0x303   :  { %v478_v37 = vmax.f32 %v475_v35, 0.0 }
 0x305   :  { %v479_v39 = vpack.c.bf16 %v478_v37, %v477_v36 }
 0x307   :  { %v481_v40 = vand.u32 %v479_v39, %v1342_v38 }
 0x309   :  { %490 = vmatpush.bf16.msrb.mxu3 %v481_v40 }
 0x30c   :  { %975 = vmatmul.msk.bf16.vlgmr.msrb.gmra.mxu3 %vm327_vm4, %v1372_v7 }
 0x30d   :  { %729 = vmatpush.bf16.msra.mxu3 %v1055_v31 }
 0x31c   :  { %976 = vmatmul.msk.bf16.gmra.mxu3 %vm327_vm4, %v1357_v48 }
 0x38f   :  { %v492_v42 = vpop.f32.mrf.mxu3 }
 0x390   :  { %v493_v56 = vadd.f32 %v492_v42, %v1413_v53 }
 0x392   :  { %v502_v61 = vmax.f32 %v493_v56, 0.0 }
 0x397   :  { %v494_v46 = vpop.f32.mrf.mxu3 }
 0x398   :  { %v495_v52 = vadd.f32 %v494_v46, %v1411_v50 }
 0x39a   :  { %v503_v59 = vmax.f32 %v495_v52, 0.0 }
 0x39c   :  { %v506_v62 = vpack.c.bf16 %v503_v59, %v502_v61 }
 0x39f   :  { %v497_v47 = vpop.f32.mrf.mxu3 }
 0x3a0   :  { %v498_v49 = vadd.f32 %v497_v47, %v1403_v45  ;;  %v1054_v45 = vld [vmem:[%s1610_s16] sm:$0xff] }
 0x3a1   :  { %730 = vmatpush.bf16.msra.mxu3 %v1054_v45 }
 0x3a2   :  { %v504_v57 = vmax.f32 %v498_v49, 0.0 }
 0x3a7   :  { %v499_v51 = vpop.f32.mrf.mxu3 }
 0x3a8   :  { %v500_v55 = vadd.f32 %v499_v51, %v1415_v54  ;;  %v1058_v51 = vld [vmem:[%s1613_s19] sm:$0xff] }
 0x3aa   :  { %v505_v58 = vmax.f32 %v500_v55, 0.0 }
 0x3ac   :  { %v507_v60 = vpack.c.bf16 %v505_v58, %v504_v57  ;;  %v1075_v58 = vld [vmem:[%s1612_s18] ss:$0 sm:$0xff] }
 0x3ae   :  { %514 = vmatpush.bf16.msrb.mxu1 %v507_v60 }
 0x3b2   :  { %515 = vmatpush.bf16.msrb.mxu1 %v506_v62 }
 0x3b5   :  { %977 = vmatmul.msk.bf16.vlgmr.msrb.gmra.mxu1 %vm228_vm5, %v374_v3  ;;  %v1052_v3 = vld [vmem:[%s1608_s14 + $0x10] sm:$0xff] }
 0x3b6   :  { %597 = vmatpush.bf16.msrb.mxu2 %v1052_v3 }
 0x3ba   :  { %692 = vmatpush.bf16.msra.mxu2 %v1057_v16 }
 0x3be   :  { %693 = vmatpush.bf16.msra.mxu2 %v1056_v17 }
 0x432   :  { %v517_v0 = vpop.f32.mrf.mxu1 }
 0x433   :  { %v518_v4 = vadd.f32 %v517_v0, %v477_v36 }
 0x43a   :  { %v519_v1 = vpop.f32.mrf.mxu1 }
 0x43b   :  { %v520_v8 = vadd.f32 %v519_v1, %v478_v37 }
 0x43d   :  { %v522_v10 = vpack.c.bf16 %v520_v8, %v518_v4 }
 0x43f   :  { %991 = vmatmul.msk.bf16.vlgmr.msrb.gmra.mxu0 %vm228_vm5, %v522_v10 }
 0x4bc   :  { %v557_v18 = vpop.f32.mrf.mxu0 }
 0x4bd   :  { %v558_v20 = vadd.f32 %v1073_v19, %v557_v18 }
 0x4bf   :  { %v562_v23 = vmax.f32 %v558_v20, 0.0 }
 0x4c4   :  { %v559_v22 = vpop.f32.mrf.mxu0 }
 0x4c5   :  { %v560_v32 = vadd.f32 %v1073_v19, %v559_v22 }
 0x4c7   :  { %v563_v33 = vmax.f32 %v560_v32, 0.0  ;;  %v1076_v32 = vld [vmem:[%s1614_s20] ss:$0 sm:$0xff] }
 0x4c9   :  { %v564_v24 = vpack.c.bf16 %v563_v33, %v562_v23 }
 0x4cb   :  { %1005 = vmatmul.msk.bf16.vlgmr.msrb.gmra.mxu2 %vm228_vm5, %v564_v24  ;;  %v1077_v24 = vld [vmem:[%s1615_s21] ss:$0 sm:$0xff] }
 0x4db   :  { %1018 = vmatmul.msk.bf16.vlgmr.msra.gmra.mxu2 %vm228_vm5, %v662_v25 }
 0x4eb   :  { %1019 = vmatmul.msk.bf16.gmra.mxu2 %vm228_vm5, %v663_v26 }
 0x54e   :  { %v599_v28 = vpop.f32.mrf.mxu2 }
 0x54f   :  { %v600_v34 = vadd.f32 %v1074_v29, %v599_v28 }
 0x556   :  { %v601_v30 = vpop.f32.mrf.mxu2 }
 0x557   :  { %v602_v35 = vadd.f32 %v1074_v29, %v601_v30 }
 0x559   :  { %v604_v50 = vpack.c.bf16 %v602_v35, %v600_v34 }
 0x55b   :  { %v606_v53 = vand.u32 %v604_v50, %v1342_v38  ;;  %v1059_v38 = vld [vmem:[%s1613_s19 + $0x8] sm:$0xff] }
 0x55d   :  { %615 = vmatpush.bf16.msra.mxu1 %v606_v53  ;;  %640 = vmatpush.bf16.msra.mxu0 %v606_v53 }
 0x55e   :  { %v695_v52 = vpop.f32.mrf.mxu2 }
 0x560   :  { %1006 = vmatmul.msk.bf16.vlgmr.msra.gmra.mxu1 %vm327_vm4, %v1372_v7  ;;  %1008 = vmatmul.msk.bf16.vlgmr.msra.gmra.mxu0 %vm327_vm4, %v1380_v21 }
 0x561   :  { %788 = vmatpush.bf16.msrb.mxu1 %v1059_v38 }
 0x565   :  { %789 = vmatpush.bf16.msrb.mxu1 %v1058_v51 }
 0x566   :  { %v697_v56 = vpop.f32.mrf.mxu2 }
 0x56e   :  { %v700_v1 = vpop.f32.mrf.mxu2 }
 0x570   :  { %1007 = vmatmul.msk.bf16.gmra.mxu1 %vm327_vm4, %v1357_v48  ;;  %1009 = vmatmul.msk.bf16.gmra.mxu0 %vm327_vm4, %v1388_v27 }
 0x576   :  { %v702_v13 = vpop.f32.mrf.mxu2 }
 0x5dd   :  { %v617_v7 = vpop.f32.mrf.mxu1  ;;  %v642_v54 = vpop.f32.mrf.mxu0 }
 0x5de   :  { %v652_v37 = vmul.f32 %v642_v54, %v617_v7 }
 0x5e5   :  { %v619_v36 = vpop.f32.mrf.mxu1  ;;  %v644_v21 = vpop.f32.mrf.mxu0 }
 0x5e6   :  { %v653_v39 = vmul.f32 %v644_v21, %v619_v36 }
 0x5e8   :  { %v656_v48 = vpack.c.bf16 %v653_v39, %v652_v37 }
 0x5ea   :  { %1028 = vmatmul.msk.bf16.vlgmr.msra.gmra.mxu3 %vm228_vm5, %v656_v48  ;;  %v861_v48 = vld [vmem:[%s1639_s5 + $0x18] sm:$0xff]  ;;  %s1116_s5 = smov [#allocation3]  }
 0x5eb   :  { %s925_s6 = sshll.u32 %s1116_s5, 4  ;;  %s926_s6 = int_to_ptr.vmem [resolvable:$true] %s925_s6 }
 0x5ed   :  { %v622_v27 = vpop.f32.mrf.mxu1  ;;  %v647_v40 = vpop.f32.mrf.mxu0 }
 0x5ee   :  { %v654_v46 = vmul.f32 %v647_v40, %v622_v27  ;;  %v1080_v27 = vpop.eup %1079 }
 0x5ef   :  { %v91_v40 = vmul.f32 %v1080_v27, %v1269_v9  ;;  %vm96_vm14 = vweird.f32 %v1080_v27 }
 0x5f0   :  { %vm97_vm15 = vmor %vm95_vm13, %vm96_vm14 }
 0x5f5   :  { %v624_v42 = vpop.f32.mrf.mxu1  ;;  %v649_v44 = vpop.f32.mrf.mxu0 }
 0x5f6   :  { %v655_v47 = vmul.f32 %v649_v44, %v624_v42  ;;  %v1082_v42 = vpop.eup %1081  ;;  %v92_v44 = vsub.f32 1.0, %v91_v40  ;;  %v851_v40 = vmul.f32 %v1291_v15, %v1291_v15 }
 0x5f7   :  { %vm111_vm2 = vweird.f32 %v1082_v42 }
 0x5f8   :  { %v657_v49 = vpack.c.bf16 %v655_v47, %v654_v46  ;;  %v106_v46 = vmul.f32 %v1082_v42, %v1291_v15  ;;  %v93_v47 = vmul.f32 %v1080_v27, %v92_v44  ;;  %vm1544_vm3 = vmor %vm110_vm1, %vm111_vm2  ;;  %v144_v44 = vand.u32 2147483647, %v1281_v12 }
 0x5fa   :  { %1029 = vmatmul.msk.bf16.gmra.mxu3 %vm228_vm5, %v657_v49  ;;  %v101_v49 = vand.u32 2147483648, %v1269_v9  ;;  %v107_v51 = vsub.f32 1.0, %v106_v46 }
 0x66d   :  { %v732_v55 = vpop.f32.mrf.mxu3 }
 0x66e   :  { %v733_v57 = vadd.f32 %v732_v55, %v695_v52  ;;  %v94_v52 = vadd.f32 %v1080_v27, %v93_v47  ;;  %v99_v55 = vand.u32 2147483647, %v1269_v9 }
 0x670   :  { %v746_v60 = vadd.f32 %v1075_v58, %v733_v57  ;;  %v1535_v57 = vpop.permute.xlu1 %869  ;;  %vm100_vm0 = vcmp.eq.f32.partialorder %v99_v55, 8.507059e+37 }
 0x672   :  { %v750_v63 = vmax.f32 %v746_v60, 0.0  ;;  %v98_v60 = vsel %vm97_vm15, %v1080_v27, %v94_v52  ;;  %vm876_vm15 = vcmp.eq.s32.totalorder %v1535_v57, %v1345_v41 }
 0x675   :  { %v734_v59 = vpop.f32.mrf.mxu3 }
 0x676   :  { %v735_v61 = vadd.f32 %v734_v59, %v697_v56  ;;  %v1084_v56 = vpop.eup %1083  ;;  %v108_v59 = vmul.f32 %v1082_v42, %v107_v51 }
 0x677   :  { %vm126_vm6 = vweird.f32 %v1084_v56 }
 0x678   :  { %v747_v62 = vadd.f32 %v1075_v58, %v735_v61  ;;  %v121_v61 = vmul.f32 %v1084_v56, %v1254_v5 }
 0x67a   :  { %v751_v0 = vmax.f32 %v747_v62, 0.0  ;;  %v158_v62 = vsub.f32 0.0, %v1259_v6 }
 0x67c   :  { %v754_v4 = vpack.c.bf16 %v751_v0, %v750_v63  ;;  %v1541_v63 = vld [vmem:[#allocation2] ss:$0 sm:$0xff] }
 0x67d   :  { %v737_v8 = vpop.f32.mrf.mxu3 }
 0x67e   :  { %1038 = vmatmul.msk.bf16.vlgmr.msrb.gmra.mxu1 %vm228_vm5, %v754_v4  ;;  %v738_v10 = vadd.f32 %v737_v8, %v700_v1  ;;  %v109_v1 = vadd.f32 %v1082_v42, %v108_v59  ;;  %v116_v4 = vand.u32 2147483648, %v1291_v15  ;;  %v161_v59 = vsub.f32 0.0, %v1276_v11 }
 0x680   :  { %v748_v16 = vadd.f32 %v1075_v58, %v738_v10  ;;  %v114_v10 = vand.u32 2147483647, %v1291_v15 }
 0x682   :  { %v752_v19 = vmax.f32 %v748_v16, 0.0  ;;  %v1549_v16 = vpop.permute.xlu2 %863  ;;  %vm115_vm4 = vcmp.eq.f32.partialorder %v114_v10, 8.507059e+37 }
 0x683   :  { %vm874_vm14 = vcmp.eq.s32.totalorder %v1549_v16, %v1345_v41 }
 0x685   :  { %v739_v3 = vpop.f32.mrf.mxu3 }
 0x686   :  { %v740_v17 = vadd.f32 %v739_v3, %v702_v13  ;;  %v122_v13 = vsub.f32 1.0, %v121_v61  ;;  %v1086_v3 = vpop.eup %1085  ;;  %v852_v61 = vmul.f32 %v1254_v5, %v1254_v5 }
 0x687   :  { %vm141_vm10 = vweird.f32 %v1086_v3 }
 0x688   :  { %v749_v18 = vadd.f32 %v1075_v58, %v740_v17  ;;  %v102_v58 = vor.u32 1.1754944e-38, %v101_v49  ;;  %vm142_vm11 = vmor %vm140_vm9, %vm141_vm10 }
 0x68a   :  { %v753_v20 = vmax.f32 %v749_v18, 0.0  ;;  %v103_v0 = vsel %vm100_vm0, %v102_v58, %v98_v60 }
 0x68b   :  { %v162_v18 = vmul.f32 %v158_v62, %v103_v0 }
 0x68c   :  { %v755_v22 = vpack.c.bf16 %v753_v20, %v752_v19  ;;  %v113_v19 = vsel %vm1544_vm3, %v1082_v42, %v109_v1  ;;  %v117_v20 = vor.u32 1.1754944e-38, %v116_v4 }
 0x68e   :  { %1039 = vmatmul.msk.bf16.gmra.mxu1 %vm228_vm5, %v755_v22  ;;  %vm125_vm5 = vweird.f32 %v1254_v5 }
 0x68f   :  { %vm1561_vm7 = vmor %vm125_vm5, %vm126_vm6 }
 0x6fb   :  { %v791_v23 = vpop.f32.mrf.mxu1 }
 0x6fc   :  { %v792_v33 = vadd.f32 %v1076_v32, %v791_v23  ;;  %v136_v23 = vmul.f32 %v1086_v3, %v1281_v12 }
 0x6fe   :  { %v801_v25 = vmax.f32 %v792_v33, 0.0 }
 0x700   :  { %v809_v26 = vmul.f32 %v1077_v24, %v801_v25  ;;  %v118_v25 = vsel %vm115_vm4, %v117_v20, %v113_v19  ;;  %v867_v19 = vpop.permute.xlu0 %866 }
 0x701   :  { %vm875_vm13 = vcmp.eq.s32.totalorder %v867_v19, %v1345_v41 }
 0x702   :  { %v814_v28 = vsel %vm813_vm12, %v809_v26, 0.0  ;;  %v129_v26 = vand.u32 2147483647, %v1254_v5 }
 0x703   :  { %v793_v29 = vpop.f32.mrf.mxu1  ;;  %815 = vadd.xlane.f32.xlu1 %v814_v28  ;;  %v131_v28 = vand.u32 2147483648, %v1254_v5 }
 0x704   :  { %v794_v30 = vadd.f32 %v1076_v32, %v793_v29  ;;  %vm130_vm8 = vcmp.eq.f32.partialorder %v129_v26, 8.507059e+37 }
 0x706   :  { %v802_v31 = vmax.f32 %v794_v30, 0.0  ;;  %v850_v30 = vmul.f32 %v1269_v9, %v1269_v9  ;;  %v160_v9 = vsub.f32 0.0, %v1246_v2 }
 0x708   :  { %v810_v34 = vmul.f32 %v1077_v24, %v802_v31 }
 0x70a   :  { %v817_v35 = vsel %vm813_vm12, %v810_v34, 0.0  ;;  %v137_v34 = vsub.f32 1.0, %v136_v23 }
 0x70b   :  { %818 = vadd.xlane.f32.xlu2 %v817_v35  ;;  %v796_v50 = vpop.f32.mrf.mxu1 }
 0x70c   :  { %v797_v53 = vadd.f32 %v1076_v32, %v796_v50 }
 0x70e   :  { %v803_v45 = vmax.f32 %v797_v53, 0.0 }
 0x710   :  { %v811_v38 = vmul.f32 %v1077_v24, %v803_v45 }
 0x712   :  { %v820_v7 = vsel %vm813_vm12, %v811_v38, 0.0  ;;  %v132_v38 = vor.u32 1.1754944e-38, %v131_v28 }
 0x713   :  { %v798_v54 = vpop.f32.mrf.mxu1  ;;  %821 = vadd.xlane.f32.xlu2 %v820_v7 }
 0x714   :  { %v799_v36 = vadd.f32 %v1076_v32, %v798_v54  ;;  %v123_v32 = vmul.f32 %v1084_v56, %v122_v13 }
 0x716   :  { %v804_v21 = vmax.f32 %v799_v36, 0.0  ;;  %v124_v31 = vadd.f32 %v1084_v56, %v123_v32 }
 0x718   :  { %v812_v37 = vmul.f32 %v1077_v24, %v804_v21  ;;  %v159_v24 = vsub.f32 0.0, %v1286_v14  ;;  %v128_v36 = vsel %vm1561_vm7, %v1084_v56, %v124_v31  ;;  %v138_v21 = vmul.f32 %v1086_v3, %v137_v34 }
 0x71a   :  { %v823_v39 = vsel %vm813_vm12, %v812_v37, 0.0  ;;  %v163_v53 = vmul.f32 %v159_v24, %v118_v25  ;;  %v139_v42 = vadd.f32 %v1086_v3, %v138_v21  ;;  %vm145_vm12 = vcmp.eq.f32.partialorder %v144_v44, 8.507059e+37 }
 0x71b   :  { %824 = vadd.xlane.f32.xlu1 %v823_v39  ;;  %v133_v39 = vsel %vm130_vm8, %v132_v38, %v128_v36 }
 0x71c   :  { %v164_v49 = vmul.f32 %v160_v9, %v133_v39  ;;  %v143_v56 = vsel %vm142_vm11, %v1086_v3, %v139_v42 }
 0x72b   :  { %872 = vperm.xlu2 %1067, %v861_v48   ;;  %v146_v48 = vand.u32 2147483648, %v1281_v12 }
 0x72d   :  { %v147_v51 = vor.u32 1.1754944e-38, %v146_v48 }
 0x72f   :  { %v148_v60 = vsel %vm145_vm12, %v147_v51, %v143_v56 }
 0x730   :  { %v165_v1 = vmul.f32 %v161_v59, %v148_v60 }
 0x776   :  { %v816_v17 = vpop.xlane.xlu1 %815 }
 0x777   :  { %v830_v6 = vadd.f32 %v1541_v63, %v816_v17  ;;  %v853_v17 = vmul.f32 %v1281_v12, %v1281_v12  ;;  %v1040_v12 = vsel %vm874_vm14, 1.0, %v1115_v43 }
 0x779   :  { %v834_v22 = vmul.f32 %v830_v6, %v103_v0 }
 0x77b   :  { %v838_v33 = vsub.f32 %v834_v22, %v162_v18 }
 0x77d   :  { %v842_v29 = vmul.f32 %v838_v33, %v838_v33  ;;  %v1042_v33 = vsel %vm876_vm15, 1.0, %v1115_v43 }
 0x77e   :  { %v819_v35 = vpop.xlane.xlu2 %818 }
 0x77f   :  { %v846_v14 = vmul.f32 0.5, %v842_v29  ;;  %v831_v45 = vadd.f32 %v1541_v63, %v819_v35 }
 0x781   :  { %v835_v7 = vmul.f32 %v831_v45, %v118_v25  ;;  %v854_v54 = vmul.f32 %v850_v30, %v846_v14 }
 0x783   :  { %v839_v37 = vsub.f32 %v835_v7, %v163_v53  ;;  %888 = vperm.xlu2 %1067, %v854_v54  }
 0x785   :  { %v843_v27 = vmul.f32 %v839_v37, %v839_v37 }
 0x786   :  { %v822_v46 = vpop.xlane.xlu2 %821 }
 0x787   :  { %v847_v47 = vmul.f32 0.5, %v843_v27  ;;  %v832_v2 = vadd.f32 %v1541_v63, %v822_v46 }
 0x789   :  { %v836_v52 = vmul.f32 %v832_v2, %v133_v39  ;;  %v855_v55 = vmul.f32 %v851_v40, %v847_v47 }
 0x78b   :  { %v840_v58 = vsub.f32 %v836_v52, %v164_v49  ;;  %893 = vperm.xlu1 %1066, %v855_v55  }
 0x78d   :  { %v844_v15 = vmul.f32 %v840_v58, %v840_v58 }
 0x78e   :  { %v825_v62 = vpop.xlane.xlu1 %824  ;;  %v873_v6 = vpop.permute.xlu2 %872 }
 0x78f   :  { %v848_v0 = vmul.f32 0.5, %v844_v15  ;;  %v833_v4 = vadd.f32 %v1541_v63, %v825_v62  ;;  %v1041_v63 = vsel %vm875_vm13, 1.0, %v1115_v43  ;;  %vm877_vm0 = vcmp.eq.s32.totalorder %v873_v6, %v1345_v41 }
 0x790   :  { %v1043_v28 = vsel %vm877_vm0, 1.0, %v1115_v43 }
 0x791   :  { %v837_v8 = vmul.f32 %v833_v4, %v148_v60  ;;  %v856_v10 = vmul.f32 %v852_v61, %v848_v0 }
 0x793   :  { %v841_v13 = vsub.f32 %v837_v8, %v165_v1  ;;  %898 = vperm.xlu1 %1066, %v856_v10  }
 0x795   :  { %v845_v3 = vmul.f32 %v841_v13, %v841_v13 }
 0x797   :  { %v849_v18 = vmul.f32 0.5, %v845_v3 }
 0x799   :  { %v857_v11 = vmul.f32 %v853_v17, %v849_v18 }
 0x79b   :  { %903 = vperm.xlu2 %1067, %v857_v11  }
 0x7dd   :  { %v889_v20 = vpop.permute.xlu2 %888 }
 0x7de   :  { %v906_v32 = vmul.f32 %v1040_v12, %v889_v20 }
 0x7f5   :  { %v904_v23 = vpop.permute.xlu2 %903 }
 0x7f6   :  { %v909_v16 = vmul.f32 %v1043_v28, %v904_v23 }
 0x7fd   :  { %v894_v5 = vpop.permute.xlu1 %893 }
 0x7fe   :  { %v907_v22 = vmul.f32 %v1041_v63, %v894_v5 }
 0x800   :  { %v910_v25 = vadd.f32 %v907_v22, %v906_v32 }
 0x805   :  { %v899_v24 = vpop.permute.xlu1 %898 }
 0x806   :  { %v908_v26 = vmul.f32 %v1042_v33, %v899_v24 }
 0x808   :  { %v911_v29 = vadd.f32 %v910_v25, %v908_v26 }
 0x80a   :  { %v912_v30 = vadd.f32 %v911_v29, %v909_v16 }
 0x80c   :  { %v913_v31 = vrot.slane %v912_v30, 4 }
 0x80e   :  { %v914_v34 = vadd.f32 %v913_v31, %v912_v30 }
 0x810   :  { %v915_v57 = vrot.slane %v914_v34, 2 }
 0x812   :  { %v916_v35 = vadd.f32 %v915_v57, %v914_v34 }
 0x814   :  { %v917_v41 = vrot.slane %v916_v35, 1 }
 0x816   :  { %v918_v50 = vadd.f32 %v917_v41, %v916_v35 }
 0x818   :  { %919 = vst [vmem:[#allocation3] sm:$0x1] %v918_v50 }
 0x819   :  { %930 = dma.vmem_to_hbm [thread:$0]  %s926_s6, 16, %s928_s0, [#allocation4]  }
 0x81a   :  { %1111 = dma.done.wait [#allocation4], 16  }
 0x81b   :  { %1112 = vsyncadd [#allocation4], 4294967280 }
 0x81c   :  { %935 = vsyncpa [#allocation4], 1 }

</bundles_post_ra>
